<compile_context>
chip_gen: v7x
topology: tpu7x:2x2x1
jax: 0.10.0
libtpu: 0.0.40
codegen_flags: <defaults>
</compile_context>

<pallas_src>
import functools

import jax
import jax.numpy as jnp
from jax import lax
from jax.experimental import pallas as pl
from jax.experimental.pallas import tpu as pltpu

_LANE = 128
_SUBLANE = 8


def _round_up(x: int, m: int) -> int:
    return ((x + m - 1) // m) * m


def _vmem_capacity_bytes() -> int:
    try:
        return int(pltpu.get_tpu_info().vmem_capacity_bytes)
    except Exception:
        return 64 * 1024 * 1024  # conservative (v7x per-core VMEM)


def _resident_spec(block_shape, index_map):
    """BlockSpec single-buffered for operands whose block never changes."""
    if hasattr(pl, "Buffered"):
        try:
            return pl.BlockSpec(block_shape, index_map,
                                pipeline_mode=pl.Buffered(1))
        except TypeError:
            pass
    return pl.BlockSpec(block_shape, index_map)


def input_embedding_kernel(seed_ref, x_ref, w_ref, b_ref, o_ref, *,
                           dropout_rate: float, apply_dropout: bool,
                           matmul_dtype):
    """One (M, N) tile: y = x @ W + b, optionally followed by inverted dropout."""
    x = x_ref[...]
    if matmul_dtype is not None:
        x = x.astype(matmul_dtype)  # W is pre-cast in the wrapper.
    y = jnp.dot(x, w_ref[...], preferred_element_type=jnp.float32)
    y = y + b_ref[...]              # (1, tn) bias broadcasts; f32 epilogue.

    if apply_dropout and dropout_rate > 0.0:
        tm, tn = y.shape
        # Counter-based hash keyed on (seed, global row, global col) -> the
        # mask is independent of the tiling and of the grid iteration order.
        rows = (lax.broadcasted_iota(jnp.int32, y.shape, 0)
                + pl.program_id(0) * tm).astype(jnp.uint32)
        cols = (lax.broadcasted_iota(jnp.int32, y.shape, 1)
                + pl.program_id(1) * tn).astype(jnp.uint32)
        seed = seed_ref[0].astype(jnp.uint32)
        h = (seed * jnp.uint32(0x27D4EB2F)
             ^ rows * jnp.uint32(0x9E3779B1)
             ^ cols * jnp.uint32(0x85EBCA77))
        h = (h ^ (h >> 16)) * jnp.uint32(0x7FEB352D)
        h = (h ^ (h >> 15)) * jnp.uint32(0x846CA68B)
        h = h ^ (h >> 16)
        threshold = jnp.uint32(
            min(int(dropout_rate * float(2 ** 32)), 2 ** 32 - 1))
        keep = h >= threshold
        scale = jnp.float32(1.0 / (1.0 - dropout_rate))
        y = jnp.where(keep, y * scale, jnp.zeros_like(y))

    o_ref[...] = y.astype(o_ref.dtype)


def input_embedding(x, w, b, seed, *, dropout_rate: float = 0.1,
                    training: bool = False, matmul_dtype=None,
                    out_dtype=None, block_rows: int | None = None,
                    block_cols: int | None = None):
    """Pallas equivalent of InputEmbedding.forward.

    x: [..., input_dim] float32
    w: [input_dim, embed_dim] float32 (transposed PyTorch nn.Linear weight)
    b: [embed_dim] float32
    seed: int32 array of shape (1,) (only used when training=True)
    """
    orig_shape = x.shape
    K = orig_shape[-1]
    N = w.shape[1]
    out_dtype = x.dtype if out_dtype is None else out_dtype

    x2 = x.reshape(-1, K)
    M = x2.shape[0]

    # Lane-dense output: pad embed_dim to a multiple of 128 with zero columns.
    # TODO(synk): hoist this pad (and the optional bf16 cast) out of the
    # per-call path by pre-materialising the padded weight once.
    n_pad = _round_up(N, _LANE)
    if n_pad != N:
        w = jnp.pad(w, ((0, 0), (0, n_pad - N)))
        b = jnp.pad(b, (0, n_pad - N))
    if matmul_dtype is not None:
        w = w.astype(matmul_dtype)  # hoisted MXU-operand cast (halves W bytes)
    b2 = b.astype(jnp.float32).reshape(1, n_pad)

    # ---- generation-aware VMEM budget ----------------------------------
    vmem_cap = _vmem_capacity_bytes()
    if vmem_cap >= 128 * 1024 * 1024:        # v5e / v6e
        vmem_limit = 96 * 1024 * 1024
    else:                                    # v7x (64 MiB per core) / fallback
        vmem_limit = 48 * 1024 * 1024
    budget = (vmem_limit * 3) // 4           # headroom for compiler scratch

    x_itemsize = x2.dtype.itemsize
    w_itemsize = w.dtype.itemsize
    o_itemsize = jnp.dtype(out_dtype).itemsize
    k_pad = _round_up(K, _LANE)              # x tile is lane-padded in VMEM

    # N (embed) tiling: keep W resident when it fits, else stream 256-aligned
    # column tiles (matches the 2x256 MXU on v6e/v7x).
    if block_cols is not None:
        tn = _round_up(min(block_cols, n_pad), _LANE)
    elif K * n_pad * w_itemsize <= budget // 2:
        tn = n_pad
    else:
        tn = max(2 * _LANE,
                 ((budget // 2) // (K * w_itemsize)) // 256 * 256)
        tn = min(tn, n_pad)
    num_n = pl.cdiv(n_pad, tn)
    w_bufs = 1 if num_n == 1 else 2          # resident vs. streamed W
    w_tile_bytes = K * tn * w_itemsize * w_bufs
    b_tile_bytes = tn * 4 * w_bufs

    # M (row) tiling: double-buffered x/out tiles + f32/u32 temporaries.
    if block_rows is None:
        per_row = 2 * x_itemsize * k_pad + 2 * o_itemsize * tn + 8 * tn
        tm = (budget - w_tile_bytes - b_tile_bytes) // per_row
        tm = max(_SUBLANE, min(1024, tm))
    else:
        tm = block_rows
    # Keep >=2 row tiles when M allows so both v7x TensorCores get work
    # (neutral on single-core v5e/v6e).
    tm = min(tm, _round_up(pl.cdiv(M, 2), _SUBLANE), _round_up(M, _SUBLANE))
    tm = _round_up(tm, _SUBLANE)
    num_m = pl.cdiv(M, tm)                   # ragged last block handled by Pallas

    kernel = functools.partial(
        input_embedding_kernel,
        dropout_rate=float(dropout_rate),
        apply_dropout=bool(training),
        matmul_dtype=matmul_dtype,
    )

    if num_n == 1:
        # Constant block index -> single-buffer (halves W's VMEM footprint).
        w_spec = _resident_spec((K, tn), lambda i, j, seed_ref: (0, j))
        b_spec = _resident_spec((1, tn), lambda i, j, seed_ref: (0, j))
    else:
        w_spec = pl.BlockSpec((K, tn), lambda i, j, seed_ref: (0, j))
        b_spec = pl.BlockSpec((1, tn), lambda i, j, seed_ref: (0, j))

    out = pl.pallas_call(
        kernel,
        out_shape=jax.ShapeDtypeStruct((M, n_pad), out_dtype),
        grid_spec=pltpu.PrefetchScalarGridSpec(
            num_scalar_prefetch=1,  # seed lands in SMEM
            grid=(num_m, num_n),
            in_specs=[
                pl.BlockSpec((tm, K), lambda i, j, seed_ref: (i, 0)),
                w_spec,
                b_spec,
            ],
            out_specs=pl.BlockSpec((tm, tn), lambda i, j, seed_ref: (i, j)),
        ),
        compiler_params=pltpu.CompilerParams(
            dimension_semantics=("parallel", "parallel"),
            vmem_limit_bytes=int(vmem_limit),
        ),
    )(seed, x2, w, b2)

    if n_pad != N:
        out = out[:, :N]
    return out.reshape(*orig_shape[:-1], N)


if __name__ == "__main__":
    batch, seq, input_dim, embed_dim = 2, 8, 16, 32
    dropout = 0.1

    key = jax.random.PRNGKey(0)
    kx, kw, kb, kx2 = jax.random.split(key, 4)

    # nn.Linear-style uniform(-1/sqrt(in), 1/sqrt(in)) init.
    bound = 1.0 / (input_dim ** 0.5)
    w = jax.random.uniform(kw, (input_dim, embed_dim), jnp.float32, -bound, bound)
    b = jax.random.uniform(kb, (embed_dim,), jnp.float32, -bound, bound)
    x = jax.random.normal(kx, (batch, seq, input_dim), jnp.float32)
    seed = jnp.array([0], dtype=jnp.int32)

    ref = x @ w + b

    # Eval-mode forward (dropout is identity, matching module.eval()).
    out = jax.block_until_ready(
        input_embedding(x, w, b, seed, dropout_rate=dropout, training=False))
    assert out.shape == (batch, seq, embed_dim)
    assert jnp.allclose(out, ref, atol=1e-5, rtol=1e-5), "mismatch vs reference"

    # Ragged-M case (M not a multiple of the row tile; no wrapper-side pad).
    x_r = jax.random.normal(kx2, (3, 5, input_dim), jnp.float32)
    out_r = jax.block_until_ready(
        input_embedding(x_r, w, b, seed, dropout_rate=dropout, training=False))
    assert jnp.allclose(out_r, x_r @ w + b, atol=1e-5, rtol=1e-5), "ragged mismatch"

    # bf16 MXU-operand path (W pre-cast in wrapper), looser tolerance.
    out_bf = jax.block_until_ready(
        input_embedding(x, w, b, seed, dropout_rate=dropout, training=False,
                        matmul_dtype=jnp.bfloat16))
    assert jnp.allclose(out_bf, ref, atol=5e-2, rtol=5e-2), "bf16 path mismatch"

    # Training-mode forward exercises the in-kernel dropout path.
    # TODO(synk): PyTorch's dropout RNG stream cannot be reproduced
    # bit-for-bit; we only check each element is either dropped (0) or kept
    # and scaled by 1/(1-p).
    out_t = jax.block_until_ready(
        input_embedding(x, w, b, seed, dropout_rate=dropout, training=True))
    scale = 1.0 / (1.0 - dropout)
    ok = jnp.logical_or(out_t == 0.0,
                        jnp.isclose(out_t, ref * scale, atol=1e-4, rtol=1e-4))
    assert out_t.shape == (batch, seq, embed_dim)
    assert bool(jnp.all(ok)), "dropout path mismatch"

    print("KERNEL_OK")
</pallas_src>

<mosaic_0001>
module attributes {stable_mosaic.version = 11 : i64} {
  func.func @input_embedding_kernel(%arg0: i32, %arg1: i32, %arg2: memref<1xi32, #tpu.memory_space<smem>>, %arg3: memref<8x16xf32, #tpu.memory_space<vmem>>, %arg4: memref<16x128xf32, #tpu.memory_space<vmem>>, %arg5: memref<1x128xf32, #tpu.memory_space<vmem>>, %arg6: memref<8x128xf32, #tpu.memory_space<vmem>>) attributes {dimension_semantics = [#tpu.dimension_semantics<parallel>, #tpu.dimension_semantics<parallel>], iteration_bounds = array<i64: 2, 1>, scalar_prefetch = 1 : i64, scratch_operands = 0 : i64, tpu.core_type = #tpu.core_type<tc>, window_params = [{transform_indices = @transform_0, window_bounds = array<i64: 8, 16>}, {pipeline_mode = #tpu.pipeline_mode<synchronous>, transform_indices = @transform_1, window_bounds = array<i64: 16, 128>}, {pipeline_mode = #tpu.pipeline_mode<synchronous>, transform_indices = @transform_2, window_bounds = array<i64: 1, 128>}, {transform_indices = @transform_3, window_bounds = array<i64: 8, 128>}]} {
    %c0 = arith.constant 0 : index
    %c0_0 = arith.constant 0 : index
    %0 = vector.load %arg3[%c0, %c0_0] : memref<8x16xf32, #tpu.memory_space<vmem>>, vector<8x16xf32>
    %c0_1 = arith.constant 0 : index
    %c0_2 = arith.constant 0 : index
    %1 = vector.load %arg4[%c0_1, %c0_2] : memref<16x128xf32, #tpu.memory_space<vmem>>, vector<16x128xf32>
    %cst = arith.constant dense<0.000000e+00> : vector<8x128xf32>
    %2 = tpu.matmul %0, %1, %cst {dimension_numbers = #tpu.dot_dimension_numbers<[1], [0], [0], [1], [0, 0, 1, 1], [], []>} : vector<8x16xf32>, vector<16x128xf32>, vector<8x128xf32> -> vector<8x128xf32>
    %c0_3 = arith.constant 0 : index
    %c0_4 = arith.constant 0 : index
    %3 = vector.load %arg5[%c0_3, %c0_4] : memref<1x128xf32, #tpu.memory_space<vmem>>, vector<1x128xf32>
    %4 = vector.broadcast %3 : vector<1x128xf32> to vector<8x128xf32>
    %5 = arith.addf %2, %4 : vector<8x128xf32>
    %c0_5 = arith.constant 0 : index
    %c0_6 = arith.constant 0 : index
    %6 = vector.load %arg6[%c0_5, %c0_6] : memref<8x128xf32, #tpu.memory_space<vmem>>, vector<8x128xf32>
    tpu.vector_store %arg6[%c0_5, %c0_6], %5 {strides = array<i32>} : memref<8x128xf32, #tpu.memory_space<vmem>>, vector<8x128xf32>,
    return
  }
  func.func @transform_0(%arg0: i32, %arg1: i32, %arg2: memref<1xi32, #tpu.memory_space<smem>>) -> (i32, i32) {
    %c0_i32 = arith.constant 0 : i32
    %c0_i32_0 = arith.constant 0 : i32
    return %arg0, %c0_i32 : i32, i32
  }
  func.func @transform_1(%arg0: i32, %arg1: i32, %arg2: memref<1xi32, #tpu.memory_space<smem>>) -> (i32, i32) {
    %c0_i32 = arith.constant 0 : i32
    %c0_i32_0 = arith.constant 0 : i32
    return %c0_i32, %arg1 : i32, i32
  }
  func.func @transform_2(%arg0: i32, %arg1: i32, %arg2: memref<1xi32, #tpu.memory_space<smem>>) -> (i32, i32) {
    %c0_i32 = arith.constant 0 : i32
    %c0_i32_0 = arith.constant 0 : i32
    return %c0_i32, %arg1 : i32, i32
  }
  func.func @transform_3(%arg0: i32, %arg1: i32, %arg2: memref<1xi32, #tpu.memory_space<smem>>) -> (i32, i32) {
    %c0_i32 = arith.constant 0 : i32
    return %arg0, %arg1 : i32, i32
  }
}

</mosaic_0001>

<bundles_post_ra>
// kernel: tpu_custom_call.1
= control target key start
LH: loop header
LB: loop body
LE: loop exit
PB: predicated region body
PF: predicated region fallthrough
CT: control target
= control target key end

     0   :  { %10 = vsyncpa [#allocation5], 0  ;;  %s946_s0 = inlined_call_operand.<no memory space> [shape: s32[1], index: 0, kind: input, shape index: {}]   ;;  %s947_s1 = inlined_call_operand.hbm [shape: f32[16,16], index: 1, kind: input, shape index: {}]   ;;  %s948_s2 = inlined_call_operand.hbm [shape: f32[16,128], index: 2, kind: input, shape index: {}]   ;;  %s949_s3 = inlined_call_operand.vmem [shape: f32[1,128], index: 3, kind: input, shape index: {}]   ;;  %s950_s4 = inlined_call_operand.hbm [shape: f32[16,128], index: 4, kind: output, shape index: {}]  }
   0x1   :  { %12 = vsyncpa [#allocation5 + $0x1], 0 }
   0x2   :  { %13 = vsyncpa [#allocation8], 0 }
   0x3   :  { %14 = vsyncpa [#allocation6], 0 }
   0x4   :  { %16 = vsyncpa [#allocation6 + $0x1], 0  ;;  %s729_s15 = smov 0   ;;  %s731_s0 = smov 0  }
   0x5   :  { %s733_s16 = smov 0   ;;  %s735_s17 = smov 0  }
   0x6   :  { %s737_s18 = smov 0   ;;  %s739_s19 = smov 0  }
   0x7 LB: > { %s441_s20 = sadd.s32 4294967295, %s694_s19   ;;  %s442_s21 = sadd.s32 4294967294, %s694_s19   ;;  %s694_s19 = sphi %s739_s19, %s22_s19   ;;  %s690_s18 = sphi %s737_s18, %s974_s18   ;;  %s686_s17 = sphi %s735_s17, %s973_s17   ;;  %s682_s16 = sphi %s733_s16, %s972_s16   ;;  %s678_s0 = sphi %s731_s0, %s971_s0   ;;  %s674_s15 = sphi %s729_s15, %s970_s15  }
   0x8   : > { %p54_p0 = scmp.ne.s32.totalorder %s678_s0, %s674_s15  ;;  %p763_p1 = scmp.eq.s32.totalorder %s441_s20, 0 }
   0x9   : > { %p767_p2 = scmp.eq.s32.totalorder %s441_s20, 1  ;;  %p138_p3 = scmp.eq.s32.totalorder %s442_s21, 1 }
   0xa   : > { %s955_s22 = scalar_select %p763_p1, 1, 0 }
   0xb   : > { %s956_s23 = scalar_select %p767_p2, 1, 0 }
   0xc   : > { %p773_p4 = por %p763_p1, %p54_p0  ;;  %p443_p5 = scmp.ge.s32.totalorder %s694_s19, 1 }
   0xd   : > { %p778_p6 = por %p138_p3, %p54_p0  ;;  %p145_p7 = scmp.lt.s32.totalorder %s694_s19, 3 }
   0xe   : > { %s957_s24 = scalar_select %p773_p4, 1, 0 }
   0xf   : > { %s958_s25 = scalar_select %p778_p6, 1, 0 }
  0x10   : > { %p783_p8 = pnand %p443_p5, %p145_p7  ;;  %s696_s27 = smov [#allocation7]  }
  0x11   : > { %s159_s28 = sshll.u32 %s696_s27, 4  ;;  %s34_s30 = sadd.s32 1, %s690_s18  ;;  %s160_s28 = int_to_ptr.vmem [resolvable:$true] %s159_s28 }
  0x12   : > { %s959_s26 = scalar_select %p783_p8, 1, 0 }
  0x13   : > { %p480_p9 = pneg %p783_p8  ;;  %s550_s7 = scalar_lea.hbm %s948_s2, 256 }
  0x14   : > { %p551_p12 = scmp.ne.s32.totalorder %s948_s2, %s550_s7  ;;  %p557_p5 = scmp.lt.u32.totalorder %s550_s7, %s948_s2 }
  0x15   : > { %p792_p11 = pnand %p480_p9, %p763_p1 }
  0x17   : > { %p552_p13 = pneg %p792_p11 }
  0x19   : > { %p553_p0 = pnand %p552_p13, %p551_p12 }
  0x1b   : > { %p554_p3 = pneg %p553_p0 }
  0x1d   : > { %p559_p7 = pnand %p557_p5, %p554_p3 }
  0x1f   : > { %562 = shalt.err (!%p559_p7)
}
  0x20   : > { %s563_s12 = scalar_lea.vmem %s160_s28, 256  ;;  %p571_p1 = scmp.lt.s32.totalorder %s160_s28, %s160_s28 }
  0x21   : > { %p564_p9 = scmp.ne.s32.totalorder %s160_s28, %s563_s12  ;;  %p572_p4 = scmp.lt.s32.totalorder %s563_s12, %s563_s12 }
  0x23   : > { %p566_p10 = pnand %p564_p9, %p552_p13  ;;  %p573_p8 = por %p572_p4, %p571_p1 }
  0x25   : > { %p567_p6 = pneg %p566_p10 }
  0x27   : > { %p574_p2 = pnand %p573_p8, %p567_p6 }
  0x29   : > { %577 = shalt.err (!%p574_p2)
}
  0x2a   : > { %s697_s13 = smov 128   ;;  %s698_s14 = smov 8  }
  0x2b   : > { %483 = dma.hbm_to_vmem [thread:$0]  (!%p792_p11), %s948_s2, 256, %s160_s28, [#allocation8], %s697_s13, %s697_s13, %s698_s14  }
  0x2c   : > { %p36_p1 = scmp.ge.s32.totalorder %s34_s30, 2  ;;  %s41_s27 = sadd.s32 1, %s682_s16 }
  0x2d   : > { %p48_p2 = scmp.ne.s32.totalorder %s682_s16, %s678_s0  ;;  %p49_p4 = scmp.eq.s32.totalorder %s694_s19, 0 }
  0x2e   : > { %s976_s30 = smov (%p36_p1, %s34_s30), 0  ;;  %p962_p8 = scmp.ne.s32.totalorder %s956_s23, 0 }
  0x2f   : > { %p819_p6 = por %p49_p4, %p48_p2  ;;  %s38_s29 = ssub.s32 %s690_s18, %s976_s30 }
  0x30   : > { %p825_p10 = por %p962_p8, %p48_p2  ;;  %p493_p12 = scmp.lt.s32.totalorder %s694_s19, 2 }
  0x31   : > { %p39_p11 = scmp.eq.s32.totalorder %s38_s29, 0  ;;  %s179_s28 = sand.u32 1, %s682_s16  }
  0x32   : > { %s447_s7 = sshll.u32 %s179_s28, 3  ;;  %s448_s9 = sshll.u32 %s690_s18, 7 }
  0x33   : > { %s834_s8 = scalar_select %p39_p11, %s682_s16, %s41_s27  }
  0x34   : > { %s840_s12 = scalar_lea.hbm %s947_s1, %s448_s9  ;;  %s183_s23 = scalar_lea.vmem [#allocation4], %s447_s7 }
  0x35   : > { %s190_s13 = sshll.u32 %s183_s23, 4  ;;  %p846_p13 = pnand %p493_p12, %p819_p6  ;;  %s842_s13 = int_to_ptr.vmem [resolvable:$true] %s190_s13 }
  0x36   : > { %s180_s20 = scalar_lea.sflag [#allocation5], %s179_s28  ;;  %s578_s21 = scalar_lea.hbm %s840_s12, 128 }
  0x37   : > { %p579_p0 = scmp.ne.s32.totalorder %s840_s12, %s578_s21  ;;  %p580_p3 = pneg %p846_p13 }
  0x38   : > { %s583_s7 = scalar_lea.hbm %s947_s1, 256  ;;  %p584_p9 = scmp.lt.u32.totalorder %s840_s12, %s947_s1 }
  0x39   : > { %p581_p5 = pnand %p580_p3, %p579_p0  ;;  %p585_p1 = scmp.lt.u32.totalorder %s583_s7, %s578_s21 }
  0x3a   : > { %p587_p4 = scmp.lt.u32.totalorder %s578_s21, %s840_s12 }
  0x3b   : > { %p582_p7 = pneg %p581_p5  ;;  %p586_p2 = por %p585_p1, %p584_p9 }
  0x3d   : > { %p588_p6 = por %p587_p4, %p586_p2 }
  0x3f   : > { %p589_p8 = pnand %p588_p6, %p582_p7 }
  0x41   : > { %592 = shalt.err (!%p589_p8)
}
  0x42   : > { %s593_s28 = scalar_lea.vmem %s842_s13, 128  ;;  %s699_s10 = smov [#allocation4]  }
  0x43   : > { %p594_p12 = scmp.ne.s32.totalorder %s842_s13, %s593_s28  ;;  %s598_s11 = sshll.u32 %s699_s10, 4  ;;  %s599_s11 = int_to_ptr.vmem [resolvable:$false] %s598_s11 }
  0x44   : > { %s600_s23 = scalar_lea.vmem %s599_s11, 256  ;;  %p601_p5 = scmp.lt.s32.totalorder %s842_s13, %s599_s11 }
  0x45   : > { %p596_p11 = pnand %p594_p12, %p580_p3  ;;  %p602_p9 = scmp.lt.s32.totalorder %s600_s23, %s593_s28 }
  0x47   : > { %p597_p0 = pneg %p596_p11  ;;  %p603_p1 = por %p602_p9, %p601_p5 }
  0x49   : > { %p604_p2 = pnand %p603_p1, %p597_p0 }
  0x4b   : > { %607 = shalt.err (!%p604_p2)
}
  0x4c   : > { %487 = dma.hbm_to_vmem [thread:$0]  (!%p846_p13), %s840_s12, 128, %s842_s13, %s180_s20  }
  0x4d   : > { %p965_p7 = scmp.ne.s32.totalorder %s959_s26, 0 }
  0x4e   : > { %s878_s21 = sand.u32 (!%p965_p7), 1, %s678_s0   ;;  %p966_p3 = scmp.ne.s32.totalorder (!%p965_p7), %s957_s24, 0 }
  0x4f   : > { %199 = sbr.rel (%p965_p7) target bundleno = 325 (0x145), region = 32  ;;  %s450_s27 = sshll.u32 (!%p965_p7), %s878_s21, 3 }
  0x50   : > { %s202_s29 = scalar_lea.sflag (!%p965_p7), [#allocation5], %s878_s21  ;;  %s205_s7 = scalar_lea.vmem (!%p965_p7), [#allocation4], %s450_s27 }
  0x56   : > { %661 = dma.done.wait (%p966_p3), %s202_s29, 128  }
  0x57   : > { %663 = vsyncadd (%p966_p3), %s202_s29, 4294967168  ;;  %p967_p4 = scmp.ne.s32.totalorder %s955_s22, 0 }
  0x59   : > { %665 = dma.done.wait (%p967_p4), [#allocation8], 256  }
  0x5a   : > { %667 = vsyncadd (%p967_p4), [#allocation8], 4294967040  ;;  %v700_v0 = vmov 0.0|0.0   ;;  %vm701_vm0 = vmmov 0   ;;  %v702_v1 = vmov 0.0   ;;  %v239_v2 = vld [vmem:[#allocation7] sm:$0xff] }
  0x5b   : > { %469 = vmatprep.subr.bf16.mxu0 %v700_v0  ;;  %466 = vmatprep.mubr.msk.f32.mxu0 %vm701_vm0, %v702_v1  ;;  %v240_v3 = vld [vmem:[#allocation7 + $0x8] sm:$0xff]  ;;  %v238_v5 = vld [vmem:[%s205_s7] sm:$0xff]  ;;  %vm248_vm1 = vcmask 130048   ;;  %s456_s22 = sshll.u32 %s686_s17, 7  ;;  %s234_s12 = scalar_lea.vmem [#allocation9], %s450_s27 }
  0x5c   : > { %v470_v4 = vpack.c.bf16 %v240_v3, %v239_v2  ;;  %v453_v6 = vld [vmem:[%s949_s3] ss:$0 sm:$0xff]  ;;  %s338_s13 = sshll.u32 %s234_s12, 4  ;;  %s897_s5 = scalar_lea.hbm %s950_s4, %s456_s22  ;;  %s899_s13 = int_to_ptr.vmem [resolvable:$true] %s338_s13 }
  0x5d   : > { %s324_s9 = scalar_lea.sflag [#allocation6], %s878_s21  ;;  %s608_s28 = scalar_lea.vmem %s899_s13, 128 }
  0x5e   : > { %471 = vmatpush3.bf16.msra.mxu0 %v470_v4  ;;  %p609_p13 = scmp.ne.s32.totalorder %s899_s13, %s608_s28  ;;  %s703_s17 = smov [#allocation9]  }
  0x5f   : > { %s612_s10 = sshll.u32 %s703_s17, 4  ;;  %s613_s10 = int_to_ptr.vmem [resolvable:$false] %s612_s10 }
  0x60   : > { %p610_p6 = pnand %p609_p13, %p825_p10  ;;  %s614_s11 = scalar_lea.vmem %s613_s10, 256 }
  0x61   : > { %467 = vmatmul.mubr.msk.f32.vlgmr.msra.gmra.mrb[0].mxu0 %vm248_vm1, %v238_v5  ;;  %p615_p12 = scmp.lt.s32.totalorder %s899_s13, %s613_s10  ;;  %p616_p11 = scmp.lt.s32.totalorder %s614_s11, %s608_s28 }
  0x62   : > { %p611_p8 = pneg %p610_p6 }
  0x63   : > { %p617_p0 = por %p616_p11, %p615_p12 }
  0x65   : > { %p618_p5 = pnand %p617_p0, %p611_p8 }
 0x134   : > { %v318_v7 = vpop.f32.mrb[0].mxu0 }
 0x135   : > { %v319_v8 = vadd.f32 %v453_v6, %v318_v7  ;;  %v468_v9 = vpop.f32.mrb[1].mxu0 }
 0x137   : > { %322 = vst [vmem:[%s234_s12] sm:$0xff] %v319_v8 }
 0x138   : > { %621 = shalt.err (!%p618_p5)
}
 0x139   : > { %s622_s23 = scalar_lea.hbm %s897_s5, 128  ;;  %s626_s29 = scalar_lea.hbm %s950_s4, 256 }
 0x13a   : > { %p623_p9 = scmp.ne.s32.totalorder %s897_s5, %s622_s23  ;;  %p627_p7 = scmp.lt.u32.totalorder %s897_s5, %s950_s4 }
 0x13b   : > { %p628_p3 = scmp.lt.u32.totalorder %s626_s29, %s622_s23  ;;  %p630_p13 = scmp.lt.u32.totalorder %s622_s23, %s897_s5 }
 0x13c   : > { %p624_p1 = pnand %p623_p9, %p825_p10 }
 0x13d   : > { %p629_p4 = por %p628_p3, %p627_p7 }
 0x13e   : > { %p625_p2 = pneg %p624_p1 }
 0x13f   : > { %p631_p6 = por %p630_p13, %p629_p4 }
 0x141   : > { %p632_p8 = pnand %p631_p6, %p625_p2 }
 0x143   : > { %635 = shalt.err (!%p632_p8)
}
 0x144   : > { %478 = dma.vmem_to_hbm [thread:$0]  (%p825_p10), %s899_s13, 128, %s897_s5, %s324_s9  }
 0x145 PF: > { %s350_s26 = sand.u32 1, %s674_s15   ;;  %p968_p12 = scmp.ne.s32.totalorder %s958_s25, 0 }
 0x146   : > { %p969_p11 = scmp.ge.s32.totalorder %s694_s19, 2  ;;  %s351_s22 = scalar_lea.sflag [#allocation6], %s350_s26 }
 0x148   : > { %p489_p0 = pnand %p969_p11, %p968_p12 }
 0x14a   : > { %669 = dma.done.wait (!%p489_p0), %s351_s22, 128  }
 0x14b   : > { %671 = vsyncadd (!%p489_p0), %s351_s22, 4294967168  ;;  %s22_s19 = sadd.s32 1, %s694_s19   ;;  %s970_s15 = smov %s678_s0 }
 0x14c   : > { %p19_p5 = scmp.ge.s32.totalorder %s22_s19, 4   ;;  %s971_s0 = smov %s682_s16 }
 0x14d   : > { %s972_s16 = smov %s834_s8  ;;  %s973_s17 = smov %s690_s18 }
 0x14e   : > { %s974_s18 = smov %s976_s30  ;;  %21 = sbr.rel (!%p19_p5) target bundleno = 7 (0x7), region = 85 }
 0x155   :  { %356 = vsyncpa [#allocation5], 1 }
 0x156   :  { %358 = vsyncpa [#allocation5 + $0x1], 1 }
 0x157   :  { %359 = vsyncpa [#allocation8], 1 }
 0x158   :  { %360 = vsyncpa [#allocation6], 1 }
 0x159   :  { %362 = vsyncpa [#allocation6 + $0x1], 1 }

</bundles_post_ra>
